<compile_context>
chip_gen: v6e
topology: v6e:2x2x1
jax: 0.10.0
libtpu: 0.0.40
codegen_flags: <defaults>
</compile_context>

<pallas_src>
import functools

import jax
import jax.numpy as jnp
from jax.experimental import pallas as pl
from jax.experimental.pallas import tpu as pltpu


# ---------------------------------------------------------------------------
# Pallas kernel: full LSTM time loop + FC head
# ---------------------------------------------------------------------------
def lstm_int_bbox_kernel(x_ref,      # [T*B, D_in]   time-major input, flattened
                         wih_ref,    # [D_in, 4H]    W_ih^T
                         whh_ref,    # [H, 4H]       W_hh^T
                         b_ref,      # [1, 4H]       b_ih + b_hh
                         w1_ref,     # [H, 16]       fc1 weight^T
                         b1_ref,     # [1, 16]
                         w2_ref,     # [out_dim, 16] fc2 weight (PyTorch layout)
                         b2_ref,     # [1, out_dim]
                         out_ref,    # [B, out_dim]
                         *, T, B):
    H = whh_ref.shape[0]
    out_dim = w2_ref.shape[0]

    # ---- input projection + bias hoisted out of the recurrence ------------
    # gates_x[t*B:(t+1)*B] = x_t @ W_ih + (b_ih + b_hh); one pipelined matmul.
    gates_x = (jnp.dot(x_ref[...], wih_ref[...],
                       preferred_element_type=jnp.float32)
               + b_ref[...])                                      # [T*B, 4H]

    # ---- loop-invariant weight load hoisted; bf16 MXU operands ------------
    whh_bf = whh_ref[...].astype(jnp.bfloat16)                    # [H, 4H]

    h = jnp.zeros((B, H), jnp.float32)
    c = jnp.zeros((B, H), jnp.float32)

    # Fully unrolled static loop (T is a compile-time constant).
    for t in range(T):
        g_x = gates_x[t * B:(t + 1) * B, :]                       # [B, 4H] static
        gates = g_x + jnp.dot(h.astype(jnp.bfloat16), whh_bf,
                              preferred_element_type=jnp.float32)  # [B, 4H]
        # Two full-width transcendentals instead of four per-gate slices.
        sig = jax.nn.sigmoid(gates)
        tnh = jnp.tanh(gates)
        # PyTorch gate order: i, f, g, o
        i_g = sig[:, 0 * H:1 * H]
        f_g = sig[:, 1 * H:2 * H]
        g_g = tnh[:, 2 * H:3 * H]
        o_g = sig[:, 3 * H:4 * H]
        c = f_g * c + i_g * g_g
        h = o_g * jnp.tanh(c)

    # ---- fc head: Linear -> ReLU -> Dropout(eval: identity) -> Linear -----
    hid = jnp.maximum(
        jnp.dot(h, w1_ref[...], preferred_element_type=jnp.float32)
        + b1_ref[...], 0.0)                                        # [B, 16]

    if out_dim == 1:
        # Avoid a K=16, N=1 MXU dot: VPU multiply + lane reduction.
        out = jnp.sum(hid * w2_ref[...], axis=-1, keepdims=True) + b2_ref[...]
    else:
        out = (jnp.dot(hid, w2_ref[...].T,
                       preferred_element_type=jnp.float32) + b2_ref[...])
    out_ref[...] = out.astype(out_ref.dtype)


# ---------------------------------------------------------------------------
# Wrapper (glue in plain JAX)
# ---------------------------------------------------------------------------
def lstm_int_bbox_forward(bboxes, params, observe_length):
    """bboxes: [B, T_total, 4] -> returns intent_pred.squeeze()."""
    bbox = bboxes[:, :observe_length, :].astype(jnp.float32)       # [B, T, 4]
    B, T, D_in = bbox.shape
    # Time-major, flattened so the input projection is one matmul in-kernel.
    x2d = jnp.transpose(bbox, (1, 0, 2)).reshape(T * B, D_in)      # [T*B, D_in]

    wih_t, whh_t, b, w1_t, b1, w2, b2 = params
    H = whh_t.shape[0]
    out_dim = w2.shape[0]

    full = lambda shape: pl.BlockSpec(shape, lambda i: (0,) * len(shape))
    kernel = functools.partial(lstm_int_bbox_kernel, T=T, B=B)

    out = pl.pallas_call(
        kernel,
        out_shape=jax.ShapeDtypeStruct((B, out_dim), jnp.float32),
        grid=(1,),
        in_specs=[
            full((T * B, D_in)),
            full((D_in, 4 * H)),
            full((H, 4 * H)),
            full((1, 4 * H)),
            full((H, 16)),
            full((1, 16)),
            full((out_dim, 16)),
            full((1, out_dim)),
        ],
        out_specs=full((B, out_dim)),
        compiler_params=pltpu.CompilerParams(
            dimension_semantics=("arbitrary",)),
    )(x2d, wih_t, whh_t, b, w1_t, b1, w2, b2)

    # LSTMInt returns [B, 1, 1, out_dim]; LSTMIntBbox returns .squeeze().
    # (Like PyTorch .squeeze(), this also drops the batch dim if B == 1.)
    return jnp.squeeze(out.reshape(B, 1, 1, out_dim))


# ---------------------------------------------------------------------------
# Deterministic parameter construction (synthetic, not a checkpoint)
# ---------------------------------------------------------------------------
def make_params(key, enc_in_dim, enc_out_dim, output_dim):
    H = enc_out_dim
    ks = jax.random.split(key, 8)
    scale = 1.0 / jnp.sqrt(H)
    # LSTM (single layer).
    w_ih = jax.random.uniform(ks[0], (4 * H, enc_in_dim), jnp.float32, -scale, scale)
    w_hh = jax.random.uniform(ks[1], (4 * H, H), jnp.float32, -scale, scale)
    b_ih = jax.random.uniform(ks[2], (4 * H,), jnp.float32, -scale, scale)
    b_hh = jax.random.uniform(ks[3], (4 * H,), jnp.float32, -scale, scale)
    # FC head
    w1 = jax.random.uniform(ks[4], (16, H), jnp.float32, -scale, scale)
    b1 = jax.random.uniform(ks[5], (16,), jnp.float32, -scale, scale)
    w2 = jax.random.uniform(ks[6], (output_dim, 16), jnp.float32, -0.25, 0.25)
    b2 = jax.random.uniform(ks[7], (output_dim,), jnp.float32, -0.25, 0.25)
    # Pre-transpose / combine for the kernel.
    return (
        w_ih.T,                      # [D_in, 4H]
        w_hh.T,                      # [H, 4H]
        (b_ih + b_hh)[None, :],      # [1, 4H]
        w1.T,                        # [H, 16]
        b1[None, :],                 # [1, 16]
        w2,                          # [out_dim, 16]  (kept in PyTorch layout)
        b2[None, :],                 # [1, out_dim]
    )


if __name__ == "__main__":
    # Small shapes consistent with the module:
    #   bboxes: [batch=2, seq_total=8, 4]; observe_length=8
    #   enc_in_dim=4, enc_out_dim=32, output_dim=1
    B, T_total, D_in = 2, 8, 4
    observe_length = 8
    enc_out_dim, output_dim = 32, 1

    key = jax.random.PRNGKey(0)
    k_data, k_param = jax.random.split(key)
    bboxes = jax.random.uniform(k_data, (B, T_total, D_in), jnp.float32)

    params = make_params(k_param, D_in, enc_out_dim, output_dim)

    intent_pred = lstm_int_bbox_forward(bboxes, params, observe_length)
    jax.block_until_ready(intent_pred)
    assert intent_pred.shape == (B,), intent_pred.shape
    print("KERNEL_OK")
</pallas_src>

<mosaic_0001>
module attributes {stable_mosaic.version = 11 : i64} {
  func.func @lstm_int_bbox_kernel(%arg0: i32, %arg1: memref<16x4xf32, #tpu.memory_space<vmem>>, %arg2: memref<4x128xf32, #tpu.memory_space<vmem>>, %arg3: memref<32x128xf32, #tpu.memory_space<vmem>>, %arg4: memref<1x128xf32, #tpu.memory_space<vmem>>, %arg5: memref<32x16xf32, #tpu.memory_space<vmem>>, %arg6: memref<1x16xf32, #tpu.memory_space<vmem>>, %arg7: memref<1x16xf32, #tpu.memory_space<vmem>>, %arg8: memref<1x1xf32, #tpu.memory_space<vmem>>, %arg9: memref<2x1xf32, #tpu.memory_space<vmem>>) attributes {dimension_semantics = [#tpu.dimension_semantics<arbitrary>], iteration_bounds = array<i64: 1>, scalar_prefetch = 0 : i64, scratch_operands = 0 : i64, tpu.core_type = #tpu.core_type<tc>, window_params = [{pipeline_mode = #tpu.pipeline_mode<synchronous>, transform_indices = @transform_0, window_bounds = array<i64: 16, 4>}, {pipeline_mode = #tpu.pipeline_mode<synchronous>, transform_indices = @transform_1, window_bounds = array<i64: 4, 128>}, {pipeline_mode = #tpu.pipeline_mode<synchronous>, transform_indices = @transform_2, window_bounds = array<i64: 32, 128>}, {pipeline_mode = #tpu.pipeline_mode<synchronous>, transform_indices = @transform_3, window_bounds = array<i64: 1, 128>}, {pipeline_mode = #tpu.pipeline_mode<synchronous>, transform_indices = @transform_4, window_bounds = array<i64: 32, 16>}, {pipeline_mode = #tpu.pipeline_mode<synchronous>, transform_indices = @transform_5, window_bounds = array<i64: 1, 16>}, {pipeline_mode = #tpu.pipeline_mode<synchronous>, transform_indices = @transform_6, window_bounds = array<i64: 1, 16>}, {pipeline_mode = #tpu.pipeline_mode<synchronous>, transform_indices = @transform_7, window_bounds = array<i64: 1, 1>}, {pipeline_mode = #tpu.pipeline_mode<synchronous>, transform_indices = @transform_8, window_bounds = array<i64: 2, 1>}]} {
    %c0 = arith.constant 0 : index
    %c0_0 = arith.constant 0 : index
    %0 = vector.load %arg1[%c0, %c0_0] : memref<16x4xf32, #tpu.memory_space<vmem>>, vector<16x4xf32>
    %c0_1 = arith.constant 0 : index
    %c0_2 = arith.constant 0 : index
    %1 = vector.load %arg2[%c0_1, %c0_2] : memref<4x128xf32, #tpu.memory_space<vmem>>, vector<4x128xf32>
    %cst = arith.constant dense<0.000000e+00> : vector<16x128xf32>
    %2 = tpu.matmul %0, %1, %cst {dimension_numbers = #tpu.dot_dimension_numbers<[1], [0], [0], [1], [0, 0, 1, 1], [], []>} : vector<16x4xf32>, vector<4x128xf32>, vector<16x128xf32> -> vector<16x128xf32>
    %c0_3 = arith.constant 0 : index
    %c0_4 = arith.constant 0 : index
    %3 = vector.load %arg4[%c0_3, %c0_4] : memref<1x128xf32, #tpu.memory_space<vmem>>, vector<1x128xf32>
    %4 = vector.broadcast %3 : vector<1x128xf32> to vector<16x128xf32>
    %5 = arith.addf %2, %4 : vector<16x128xf32>
    %c0_5 = arith.constant 0 : index
    %c0_6 = arith.constant 0 : index
    %6 = vector.load %arg3[%c0_5, %c0_6] : memref<32x128xf32, #tpu.memory_space<vmem>>, vector<32x128xf32>
    %7 = arith.truncf %6 : vector<32x128xf32> to vector<32x128xbf16>
    %cst_7 = arith.constant 0.000000e+00 : f32
    %8 = vector.broadcast %cst_7 : f32 to vector<2x32xf32>
    %cst_8 = arith.constant 0.000000e+00 : f32
    %9 = vector.broadcast %cst_8 : f32 to vector<2x32xf32>
    %10 = vector.extract_strided_slice %5 {offsets = [0, 0], sizes = [2, 128], strides = [1, 1]} : vector<16x128xf32> to vector<2x128xf32>
    %11 = arith.truncf %8 : vector<2x32xf32> to vector<2x32xbf16>
    %cst_9 = arith.constant dense<0.000000e+00> : vector<2x128xf32>
    %12 = tpu.matmul %11, %7, %cst_9 {dimension_numbers = #tpu.dot_dimension_numbers<[1], [0], [0], [1], [0, 0, 1, 1], [], []>} : vector<2x32xbf16>, vector<32x128xbf16>, vector<2x128xf32> -> vector<2x128xf32>
    %13 = arith.addf %10, %12 : vector<2x128xf32>
    %14 = arith.negf %13 : vector<2x128xf32>
    %15 = math.exp %14 : vector<2x128xf32>
    %cst_10 = arith.constant 1.000000e+00 : f32
    %16 = vector.broadcast %cst_10 : f32 to vector<2x128xf32>
    %17 = arith.addf %16, %15 : vector<2x128xf32>
    %18 = arith.divf %16, %17 : vector<2x128xf32>
    %19 = math.tanh %13 : vector<2x128xf32>
    %20 = vector.extract_strided_slice %18 {offsets = [0, 0], sizes = [2, 32], strides = [1, 1]} : vector<2x128xf32> to vector<2x32xf32>
    %21 = vector.extract_strided_slice %18 {offsets = [0, 32], sizes = [2, 32], strides = [1, 1]} : vector<2x128xf32> to vector<2x32xf32>
    %22 = vector.extract_strided_slice %19 {offsets = [0, 64], sizes = [2, 32], strides = [1, 1]} : vector<2x128xf32> to vector<2x32xf32>
    %23 = vector.extract_strided_slice %18 {offsets = [0, 96], sizes = [2, 32], strides = [1, 1]} : vector<2x128xf32> to vector<2x32xf32>
    %24 = arith.mulf %21, %9 : vector<2x32xf32>
    %25 = arith.mulf %20, %22 : vector<2x32xf32>
    %26 = arith.addf %24, %25 : vector<2x32xf32>
    %27 = math.tanh %26 : vector<2x32xf32>
    %28 = arith.mulf %23, %27 : vector<2x32xf32>
    %29 = vector.extract_strided_slice %5 {offsets = [2, 0], sizes = [2, 128], strides = [1, 1]} : vector<16x128xf32> to vector<2x128xf32>
    %30 = arith.truncf %28 : vector<2x32xf32> to vector<2x32xbf16>
    %cst_11 = arith.constant dense<0.000000e+00> : vector<2x128xf32>
    %31 = tpu.matmul %30, %7, %cst_11 {dimension_numbers = #tpu.dot_dimension_numbers<[1], [0], [0], [1], [0, 0, 1, 1], [], []>} : vector<2x32xbf16>, vector<32x128xbf16>, vector<2x128xf32> -> vector<2x128xf32>
    %32 = arith.addf %29, %31 : vector<2x128xf32>
    %33 = arith.negf %32 : vector<2x128xf32>
    %34 = math.exp %33 : vector<2x128xf32>
    %cst_12 = arith.constant 1.000000e+00 : f32
    %35 = vector.broadcast %cst_12 : f32 to vector<2x128xf32>
    %36 = arith.addf %35, %34 : vector<2x128xf32>
    %37 = arith.divf %35, %36 : vector<2x128xf32>
    %38 = math.tanh %32 : vector<2x128xf32>
    %39 = vector.extract_strided_slice %37 {offsets = [0, 0], sizes = [2, 32], strides = [1, 1]} : vector<2x128xf32> to vector<2x32xf32>
    %40 = vector.extract_strided_slice %37 {offsets = [0, 32], sizes = [2, 32], strides = [1, 1]} : vector<2x128xf32> to vector<2x32xf32>
    %41 = vector.extract_strided_slice %38 {offsets = [0, 64], sizes = [2, 32], strides = [1, 1]} : vector<2x128xf32> to vector<2x32xf32>
    %42 = vector.extract_strided_slice %37 {offsets = [0, 96], sizes = [2, 32], strides = [1, 1]} : vector<2x128xf32> to vector<2x32xf32>
    %43 = arith.mulf %40, %26 : vector<2x32xf32>
    %44 = arith.mulf %39, %41 : vector<2x32xf32>
    %45 = arith.addf %43, %44 : vector<2x32xf32>
    %46 = math.tanh %45 : vector<2x32xf32>
    %47 = arith.mulf %42, %46 : vector<2x32xf32>
    %48 = vector.extract_strided_slice %5 {offsets = [4, 0], sizes = [2, 128], strides = [1, 1]} : vector<16x128xf32> to vector<2x128xf32>
    %49 = arith.truncf %47 : vector<2x32xf32> to vector<2x32xbf16>
    %cst_13 = arith.constant dense<0.000000e+00> : vector<2x128xf32>
    %50 = tpu.matmul %49, %7, %cst_13 {dimension_numbers = #tpu.dot_dimension_numbers<[1], [0], [0], [1], [0, 0, 1, 1], [], []>} : vector<2x32xbf16>, vector<32x128xbf16>, vector<2x128xf32> -> vector<2x128xf32>
    %51 = arith.addf %48, %50 : vector<2x128xf32>
    %52 = arith.negf %51 : vector<2x128xf32>
    %53 = math.exp %52 : vector<2x128xf32>
    %cst_14 = arith.constant 1.000000e+00 : f32
    %54 = vector.broadcast %cst_14 : f32 to vector<2x128xf32>
    %55 = arith.addf %54, %53 : vector<2x128xf32>
    %56 = arith.divf %54, %55 : vector<2x128xf32>
    %57 = math.tanh %51 : vector<2x128xf32>
    %58 = vector.extract_strided_slice %56 {offsets = [0, 0], sizes = [2, 32], strides = [1, 1]} : vector<2x128xf32> to vector<2x32xf32>
    %59 = vector.extract_strided_slice %56 {offsets = [0, 32], sizes = [2, 32], strides = [1, 1]} : vector<2x128xf32> to vector<2x32xf32>
    %60 = vector.extract_strided_slice %57 {offsets = [0, 64], sizes = [2, 32], strides = [1, 1]} : vector<2x128xf32> to vector<2x32xf32>
    %61 = vector.extract_strided_slice %56 {offsets = [0, 96], sizes = [2, 32], strides = [1, 1]} : vector<2x128xf32> to vector<2x32xf32>
    %62 = arith.mulf %59, %45 : vector<2x32xf32>
    %63 = arith.mulf %58, %60 : vector<2x32xf32>
    %64 = arith.addf %62, %63 : vector<2x32xf32>
    %65 = math.tanh %64 : vector<2x32xf32>
    %66 = arith.mulf %61, %65 : vector<2x32xf32>
    %67 = vector.extract_strided_slice %5 {offsets = [6, 0], sizes = [2, 128], strides = [1, 1]} : vector<16x128xf32> to vector<2x128xf32>
    %68 = arith.truncf %66 : vector<2x32xf32> to vector<2x32xbf16>
    %cst_15 = arith.constant dense<0.000000e+00> : vector<2x128xf32>
    %69 = tpu.matmul %68, %7, %cst_15 {dimension_numbers = #tpu.dot_dimension_numbers<[1], [0], [0], [1], [0, 0, 1, 1], [], []>} : vector<2x32xbf16>, vector<32x128xbf16>, vector<2x128xf32> -> vector<2x128xf32>
    %70 = arith.addf %67, %69 : vector<2x128xf32>
    %71 = arith.negf %70 : vector<2x128xf32>
    %72 = math.exp %71 : vector<2x128xf32>
    %cst_16 = arith.constant 1.000000e+00 : f32
    %73 = vector.broadcast %cst_16 : f32 to vector<2x128xf32>
    %74 = arith.addf %73, %72 : vector<2x128xf32>
    %75 = arith.divf %73, %74 : vector<2x128xf32>
    %76 = math.tanh %70 : vector<2x128xf32>
    %77 = vector.extract_strided_slice %75 {offsets = [0, 0], sizes = [2, 32], strides = [1, 1]} : vector<2x128xf32> to vector<2x32xf32>
    %78 = vector.extract_strided_slice %75 {offsets = [0, 32], sizes = [2, 32], strides = [1, 1]} : vector<2x128xf32> to vector<2x32xf32>
    %79 = vector.extract_strided_slice %76 {offsets = [0, 64], sizes = [2, 32], strides = [1, 1]} : vector<2x128xf32> to vector<2x32xf32>
    %80 = vector.extract_strided_slice %75 {offsets = [0, 96], sizes = [2, 32], strides = [1, 1]} : vector<2x128xf32> to vector<2x32xf32>
    %81 = arith.mulf %78, %64 : vector<2x32xf32>
    %82 = arith.mulf %77, %79 : vector<2x32xf32>
    %83 = arith.addf %81, %82 : vector<2x32xf32>
    %84 = math.tanh %83 : vector<2x32xf32>
    %85 = arith.mulf %80, %84 : vector<2x32xf32>
    %86 = vector.extract_strided_slice %5 {offsets = [8, 0], sizes = [2, 128], strides = [1, 1]} : vector<16x128xf32> to vector<2x128xf32>
    %87 = arith.truncf %85 : vector<2x32xf32> to vector<2x32xbf16>
    %cst_17 = arith.constant dense<0.000000e+00> : vector<2x128xf32>
    %88 = tpu.matmul %87, %7, %cst_17 {dimension_numbers = #tpu.dot_dimension_numbers<[1], [0], [0], [1], [0, 0, 1, 1], [], []>} : vector<2x32xbf16>, vector<32x128xbf16>, vector<2x128xf32> -> vector<2x128xf32>
    %89 = arith.addf %86, %88 : vector<2x128xf32>
    %90 = arith.negf %89 : vector<2x128xf32>
    %91 = math.exp %90 : vector<2x128xf32>
    %cst_18 = arith.constant 1.000000e+00 : f32
    %92 = vector.broadcast %cst_18 : f32 to vector<2x128xf32>
    %93 = arith.addf %92, %91 : vector<2x128xf32>
    %94 = arith.divf %92, %93 : vector<2x128xf32>
    %95 = math.tanh %89 : vector<2x128xf32>
    %96 = vector.extract_strided_slice %94 {offsets = [0, 0], sizes = [2, 32], strides = [1, 1]} : vector<2x128xf32> to vector<2x32xf32>
    %97 = vector.extract_strided_slice %94 {offsets = [0, 32], sizes = [2, 32], strides = [1, 1]} : vector<2x128xf32> to vector<2x32xf32>
    %98 = vector.extract_strided_slice %95 {offsets = [0, 64], sizes = [2, 32], strides = [1, 1]} : vector<2x128xf32> to vector<2x32xf32>
    %99 = vector.extract_strided_slice %94 {offsets = [0, 96], sizes = [2, 32], strides = [1, 1]} : vector<2x128xf32> to vector<2x32xf32>
    %100 = arith.mulf %97, %83 : vector<2x32xf32>
    %101 = arith.mulf %96, %98 : vector<2x32xf32>
    %102 = arith.addf %100, %101 : vector<2x32xf32>
    %103 = math.tanh %102 : vector<2x32xf32>
    %104 = arith.mulf %99, %103 : vector<2x32xf32>
    %105 = vector.extract_strided_slice %5 {offsets = [10, 0], sizes = [2, 128], strides = [1, 1]} : vector<16x128xf32> to vector<2x128xf32>
    %106 = arith.truncf %104 : vector<2x32xf32> to vector<2x32xbf16>
    %cst_19 = arith.constant dense<0.000000e+00> : vector<2x128xf32>
    %107 = tpu.matmul %106, %7, %cst_19 {dimension_numbers = #tpu.dot_dimension_numbers<[1], [0], [0], [1], [0, 0, 1, 1], [], []>} : vector<2x32xbf16>, vector<32x128xbf16>, vector<2x128xf32> -> vector<2x128xf32>
    %108 = arith.addf %105, %107 : vector<2x128xf32>
    %109 = arith.negf %108 : vector<2x128xf32>
    %110 = math.exp %109 : vector<2x128xf32>
    %cst_20 = arith.constant 1.000000e+00 : f32
    %111 = vector.broadcast %cst_20 : f32 to vector<2x128xf32>
    %112 = arith.addf %111, %110 : vector<2x128xf32>
    %113 = arith.divf %111, %112 : vector<2x128xf32>
    %114 = math.tanh %108 : vector<2x128xf32>
    %115 = vector.extract_strided_slice %113 {offsets = [0, 0], sizes = [2, 32], strides = [1, 1]} : vector<2x128xf32> to vector<2x32xf32>
    %116 = vector.extract_strided_slice %113 {offsets = [0, 32], sizes = [2, 32], strides = [1, 1]} : vector<2x128xf32> to vector<2x32xf32>
    %117 = vector.extract_strided_slice %114 {offsets = [0, 64], sizes = [2, 32], strides = [1, 1]} : vector<2x128xf32> to vector<2x32xf32>
    %118 = vector.extract_strided_slice %113 {offsets = [0, 96], sizes = [2, 32], strides = [1, 1]} : vector<2x128xf32> to vector<2x32xf32>
    %119 = arith.mulf %116, %102 : vector<2x32xf32>
    %120 = arith.mulf %115, %117 : vector<2x32xf32>
    %121 = arith.addf %119, %120 : vector<2x32xf32>
    %122 = math.tanh %121 : vector<2x32xf32>
    %123 = arith.mulf %118, %122 : vector<2x32xf32>
    %124 = vector.extract_strided_slice %5 {offsets = [12, 0], sizes = [2, 128], strides = [1, 1]} : vector<16x128xf32> to vector<2x128xf32>
    %125 = arith.truncf %123 : vector<2x32xf32> to vector<2x32xbf16>
    %cst_21 = arith.constant dense<0.000000e+00> : vector<2x128xf32>
    %126 = tpu.matmul %125, %7, %cst_21 {dimension_numbers = #tpu.dot_dimension_numbers<[1], [0], [0], [1], [0, 0, 1, 1], [], []>} : vector<2x32xbf16>, vector<32x128xbf16>, vector<2x128xf32> -> vector<2x128xf32>
    %127 = arith.addf %124, %126 : vector<2x128xf32>
    %128 = arith.negf %127 : vector<2x128xf32>
    %129 = math.exp %128 : vector<2x128xf32>
    %cst_22 = arith.constant 1.000000e+00 : f32
    %130 = vector.broadcast %cst_22 : f32 to vector<2x128xf32>
    %131 = arith.addf %130, %129 : vector<2x128xf32>
    %132 = arith.divf %130, %131 : vector<2x128xf32>
    %133 = math.tanh %127 : vector<2x128xf32>
    %134 = vector.extract_strided_slice %132 {offsets = [0, 0], sizes = [2, 32], strides = [1, 1]} : vector<2x128xf32> to vector<2x32xf32>
    %135 = vector.extract_strided_slice %132 {offsets = [0, 32], sizes = [2, 32], strides = [1, 1]} : vector<2x128xf32> to vector<2x32xf32>
    %136 = vector.extract_strided_slice %133 {offsets = [0, 64], sizes = [2, 32], strides = [1, 1]} : vector<2x128xf32> to vector<2x32xf32>
    %137 = vector.extract_strided_slice %132 {offsets = [0, 96], sizes = [2, 32], strides = [1, 1]} : vector<2x128xf32> to vector<2x32xf32>
    %138 = arith.mulf %135, %121 : vector<2x32xf32>
    %139 = arith.mulf %134, %136 : vector<2x32xf32>
    %140 = arith.addf %138, %139 : vector<2x32xf32>
    %141 = math.tanh %140 : vector<2x32xf32>
    %142 = arith.mulf %137, %141 : vector<2x32xf32>
    %143 = vector.extract_strided_slice %5 {offsets = [14, 0], sizes = [2, 128], strides = [1, 1]} : vector<16x128xf32> to vector<2x128xf32>
    %144 = arith.truncf %142 : vector<2x32xf32> to vector<2x32xbf16>
    %cst_23 = arith.constant dense<0.000000e+00> : vector<2x128xf32>
    %145 = tpu.matmul %144, %7, %cst_23 {dimension_numbers = #tpu.dot_dimension_numbers<[1], [0], [0], [1], [0, 0, 1, 1], [], []>} : vector<2x32xbf16>, vector<32x128xbf16>, vector<2x128xf32> -> vector<2x128xf32>
    %146 = arith.addf %143, %145 : vector<2x128xf32>
    %147 = arith.negf %146 : vector<2x128xf32>
    %148 = math.exp %147 : vector<2x128xf32>
    %cst_24 = arith.constant 1.000000e+00 : f32
    %149 = vector.broadcast %cst_24 : f32 to vector<2x128xf32>
    %150 = arith.addf %149, %148 : vector<2x128xf32>
    %151 = arith.divf %149, %150 : vector<2x128xf32>
    %152 = math.tanh %146 : vector<2x128xf32>
    %153 = vector.extract_strided_slice %151 {offsets = [0, 0], sizes = [2, 32], strides = [1, 1]} : vector<2x128xf32> to vector<2x32xf32>
    %154 = vector.extract_strided_slice %151 {offsets = [0, 32], sizes = [2, 32], strides = [1, 1]} : vector<2x128xf32> to vector<2x32xf32>
    %155 = vector.extract_strided_slice %152 {offsets = [0, 64], sizes = [2, 32], strides = [1, 1]} : vector<2x128xf32> to vector<2x32xf32>
    %156 = vector.extract_strided_slice %151 {offsets = [0, 96], sizes = [2, 32], strides = [1, 1]} : vector<2x128xf32> to vector<2x32xf32>
    %157 = arith.mulf %154, %140 : vector<2x32xf32>
    %158 = arith.mulf %153, %155 : vector<2x32xf32>
    %159 = arith.addf %157, %158 : vector<2x32xf32>
    %160 = math.tanh %159 : vector<2x32xf32>
    %161 = arith.mulf %156, %160 : vector<2x32xf32>
    %c0_25 = arith.constant 0 : index
    %c0_26 = arith.constant 0 : index
    %162 = vector.load %arg5[%c0_25, %c0_26] : memref<32x16xf32, #tpu.memory_space<vmem>>, vector<32x16xf32>
    %cst_27 = arith.constant dense<0.000000e+00> : vector<2x16xf32>
    %163 = tpu.matmul %161, %162, %cst_27 {dimension_numbers = #tpu.dot_dimension_numbers<[1], [0], [0], [1], [0, 0, 1, 1], [], []>} : vector<2x32xf32>, vector<32x16xf32>, vector<2x16xf32> -> vector<2x16xf32>
    %c0_28 = arith.constant 0 : index
    %c0_29 = arith.constant 0 : index
    %164 = vector.load %arg6[%c0_28, %c0_29] : memref<1x16xf32, #tpu.memory_space<vmem>>, vector<1x16xf32>
    %165 = vector.broadcast %164 : vector<1x16xf32> to vector<2x16xf32>
    %166 = arith.addf %163, %165 : vector<2x16xf32>
    %cst_30 = arith.constant 0.000000e+00 : f32
    %167 = vector.broadcast %cst_30 : f32 to vector<2x16xf32>
    %168 = arith.maximumf %166, %167 : vector<2x16xf32>
    %c0_31 = arith.constant 0 : index
    %c0_32 = arith.constant 0 : index
    %169 = vector.load %arg7[%c0_31, %c0_32] : memref<1x16xf32, #tpu.memory_space<vmem>>, vector<1x16xf32>
    %170 = vector.broadcast %169 : vector<1x16xf32> to vector<2x16xf32>
    %171 = arith.mulf %168, %170 : vector<2x16xf32>
    %cst_33 = arith.constant dense<0.000000e+00> : vector<2xf32>
    %172 = vector.multi_reduction <add>, %171, %cst_33 [1] : vector<2x16xf32> to vector<2xf32>
    %173 = vector.shape_cast %172 : vector<2xf32> to vector<2x1xf32>
    %c0_34 = arith.constant 0 : index
    %c0_35 = arith.constant 0 : index
    %174 = vector.load %arg8[%c0_34, %c0_35] : memref<1x1xf32, #tpu.memory_space<vmem>>, vector<1x1xf32>
    %175 = vector.broadcast %174 : vector<1x1xf32> to vector<2x1xf32>
    %176 = arith.addf %173, %175 : vector<2x1xf32>
    %c0_36 = arith.constant 0 : index
    %c0_37 = arith.constant 0 : index
    %177 = vector.load %arg9[%c0_36, %c0_37] : memref<2x1xf32, #tpu.memory_space<vmem>>, vector<2x1xf32>
    tpu.vector_store %arg9[%c0_36, %c0_37], %176 {strides = array<i32>} : memref<2x1xf32, #tpu.memory_space<vmem>>, vector<2x1xf32>,
    return
  }
  func.func @transform_0(%arg0: i32) -> (i32, i32) {
    %c0_i32 = arith.constant 0 : i32
    %c0_i32_0 = arith.constant 0 : i32
    %c0_i32_1 = arith.constant 0 : i32
    return %c0_i32, %c0_i32_0 : i32, i32
  }
  func.func @transform_1(%arg0: i32) -> (i32, i32) {
    %c0_i32 = arith.constant 0 : i32
    %c0_i32_0 = arith.constant 0 : i32
    %c0_i32_1 = arith.constant 0 : i32
    return %c0_i32, %c0_i32_0 : i32, i32
  }
  func.func @transform_2(%arg0: i32) -> (i32, i32) {
    %c0_i32 = arith.constant 0 : i32
    %c0_i32_0 = arith.constant 0 : i32
    %c0_i32_1 = arith.constant 0 : i32
    return %c0_i32, %c0_i32_0 : i32, i32
  }
  func.func @transform_3(%arg0: i32) -> (i32, i32) {
    %c0_i32 = arith.constant 0 : i32
    %c0_i32_0 = arith.constant 0 : i32
    %c0_i32_1 = arith.constant 0 : i32
    return %c0_i32, %c0_i32_0 : i32, i32
  }
  func.func @transform_4(%arg0: i32) -> (i32, i32) {
    %c0_i32 = arith.constant 0 : i32
    %c0_i32_0 = arith.constant 0 : i32
    %c0_i32_1 = arith.constant 0 : i32
    return %c0_i32, %c0_i32_0 : i32, i32
  }
  func.func @transform_5(%arg0: i32) -> (i32, i32) {
    %c0_i32 = arith.constant 0 : i32
    %c0_i32_0 = arith.constant 0 : i32
    %c0_i32_1 = arith.constant 0 : i32
    return %c0_i32, %c0_i32_0 : i32, i32
  }
  func.func @transform_6(%arg0: i32) -> (i32, i32) {
    %c0_i32 = arith.constant 0 : i32
    %c0_i32_0 = arith.constant 0 : i32
    %c0_i32_1 = arith.constant 0 : i32
    return %c0_i32, %c0_i32_0 : i32, i32
  }
  func.func @transform_7(%arg0: i32) -> (i32, i32) {
    %c0_i32 = arith.constant 0 : i32
    %c0_i32_0 = arith.constant 0 : i32
    %c0_i32_1 = arith.constant 0 : i32
    return %c0_i32, %c0_i32_0 : i32, i32
  }
  func.func @transform_8(%arg0: i32) -> (i32, i32) {
    %c0_i32 = arith.constant 0 : i32
    %c0_i32_0 = arith.constant 0 : i32
    %c0_i32_1 = arith.constant 0 : i32
    return %c0_i32, %c0_i32_0 : i32, i32
  }
}

</mosaic_0001>

<bundles_post_ra>
// kernel: tpu_custom_call.1
= control target key start
LH: loop header
LB: loop body
LE: loop exit
PB: predicated region body
PF: predicated region fallthrough
CT: control target
= control target key end

     0   :  { %vm49_vm0 = vcmask 1043456   ;;  %vm42_vm1 = vcmask 31744   ;;  %v1069_v1 = vmov 0.0   ;;  %vm1070_vm2 = vmmov 0   ;;  %s1072_s18 = smov 64   ;;  %s1281_s1 = inlined_call_operand.vmem [shape: f32[4,128], index: 1, kind: input, shape index: {}]   ;;  %s1282_s0 = inlined_call_operand.vmem [shape: f32[16,4], index: 0, kind: input, shape index: {}]   ;;  %s1283_s2 = inlined_call_operand.vmem [shape: f32[32,128], index: 2, kind: input, shape index: {}]   ;;  %s1284_s3 = inlined_call_operand.vmem [shape: f32[1,128], index: 3, kind: input, shape index: {}]   ;;  %s1285_s4 = inlined_call_operand.vmem [shape: f32[32,16], index: 4, kind: input, shape index: {}]   ;;  %s1286_s7 = inlined_call_operand.<no memory space> [shape: f32[1,1], index: 7, kind: input, shape index: {}]   ;;  %s1287_s5 = inlined_call_operand.vmem [shape: f32[1,16], index: 5, kind: input, shape index: {}]   ;;  %s1288_s6 = inlined_call_operand.vmem [shape: f32[1,16], index: 6, kind: input, shape index: {}]   ;;  %s1289_s8 = inlined_call_operand.vmem [shape: f32[2,1], index: 8, kind: output, shape index: {}]  }
   0x1   :  { %v34_v0 = vld [vmem:[%s1281_s1] sm:$0xf]  ;;  %925 = vmatprep.subr.bf16.mxu1 %v1069_v1  ;;  %v33_v3 = vld [vmem:[%s1282_s0 + $0x8] sm:$0xff]  ;;  %929 = vmatprep.mubr.msk.bf16.mxu1 %vm1070_vm2, %v1069_v1  ;;  %v130_v4 = vld [vmem:[%s1283_s2 + $0x10] sm:$0xff]  ;;  %v1071_v10 = vmov 0   ;;  %vm134_vm3 = vcmask 261120  }
   0x2   :  { %v32_v2 = vld [vmem:[%s1282_s0] sm:$0xff]  ;;  %920 = vmatprep.subr.msk.mxu0 %vm49_vm0, %v34_v0  ;;  %v131_v5 = vld [vmem:[%s1283_s2 + $0x18] sm:$0xff]  ;;  %v129_v8 = vld [vmem:[%s1283_s2 + $0x8] sm:$0xff]  ;;  %vm847_vm4 = vcmask 123904   ;;  %vm859_vm5 = vcmask 1024  }
   0x3   :  { %922 = vmatprep.mubr.msk.f32.mxu0 %vm42_vm1, %v32_v2  ;;  %v128_v6 = vld [vmem:[%s1283_s2] sm:$0xff]  ;;  %921 = vmatpush3.msk.msra.mxu0 %vm49_vm0, %v34_v0  ;;  %v1143_v7 = vpack.c.bf16 %v131_v5, %v130_v4 }
   0x4   :  { %923 = vmatmul.mubr.msk.f32.vlgmr.msra.gmra.mxu0 %vm42_vm1, %v33_v3  ;;  %933 = vmatprep.subr.bf16.mxu0 %v1069_v1  ;;  %v1151_v9 = vpack.c.bf16 %v129_v8, %v128_v6  ;;  %v865_v11 = vld [vmem:[%s1284_s3] ss:$0 sm:$0xff]  ;;  %s1073_s3 = smov 32  }
   0x5   :  { %926 = vmatpush3.bf16.msra.mxu1 %v1143_v7  ;;  %934 = vmatpush3.bf16.msra.mxu0 %v1143_v7 }
   0x6   :  { %927 = vmatprep.subr.bf16.mxu1 %v1069_v1  ;;  %935 = vmatprep.subr.bf16.mxu0 %v1069_v1 }
   0x7   :  { %937 = vmatprep.mubr.msk.bf16.mxu0 %vm1070_vm2, %v1069_v1 }
   0x9   :  { %928 = vmatpush3.bf16.msra.mxu1 %v1151_v9  ;;  %936 = vmatpush3.bf16.msra.mxu0 %v1151_v9 }
   0xa   :  { %941 = vmatprep.subr.bf16.mxu1 %v1069_v1  ;;  %949 = vmatprep.subr.bf16.mxu0 %v1069_v1 }
   0xc   :  { %930 = vmatmul.mubr.bf16.vlgmr.msra.gmra.mxu1 %v1071_v10 }
   0xd   :  { %942 = vmatpush3.bf16.msra.mxu1 %v1143_v7  ;;  %945 = vmatprep.mubr.msk.bf16.mxu1 %vm1070_vm2, %v1069_v1 }
   0xe   :  { %943 = vmatprep.subr.bf16.mxu1 %v1069_v1 }
  0x11   :  { %944 = vmatpush3.bf16.msra.mxu1 %v1151_v9 }
  0x12   :  { %957 = vmatprep.subr.bf16.mxu1 %v1069_v1 }
  0xc4   :  { %v924_v12 = vpop.f32.mrf.mxu0 }
  0xc5   :  { %v1171_v13 = vadd.f32 %v924_v12, %v865_v11 }
  0xc6   :  { %v119_v14 = vpop.f32.mrf.mxu0 }
  0xc7   :  { %v1173_v15 = vadd.f32 %v865_v11, %v119_v14 }
  0xcc   :  { %v172_v16 = vpop.f32.mrf.mxu1 }
  0xcd   :  { %v178_v17 = vadd.f32 %v172_v16, %v1173_v15 }
  0xce   :  { %v931_v18 = vpop.f32.mrf.mxu1 }
  0xcf   :  { %1005 = vtanh.f32 %v178_v17  ;;  %v869_v22 = vmul.f32 -1.442695, %v178_v17 }
  0xd0   :  { %v175_v19 = vpop.f32.mrf.mxu1 }
  0xd1   :  { %1007 = vpow2.f32 %v869_v22 }
  0xd2   :  { %v932_v20 = vpop.f32.mrf.mxu1 }
  0xdc   :  { %v1006_v21 = vpop.eup %1005 }
  0xdd   :  { %188 = vrot.lane.b32.xlu0 %v1006_v21, %s1072_s18 }
  0xde   :  { %v1008_v23 = vpop.eup %1007 }
  0xdf   :  { %v182_v24 = vadd.f32 1.0, %v1008_v23 }
  0xe1   :  { %1009 = vrcp.f32 %v182_v24 }
  0xee   :  { %v1010_v25 = vpop.eup %1009 }
  0xef   :  { %v186_v28 = vmul.f32 0.0, %v1010_v25 }
 0x14f   :  { %v189_v26 = vpop.permute.xlu0 %188 }
 0x150   :  { %v191_v27 = vmul.f32 %v1010_v25, %v189_v26 }
 0x152   :  { %193 = vrot.lane.b32.xlu0 %v191_v27, %s1073_s3 }
 0x1c4   :  { %v194_v29 = vpop.permute.xlu0 %193 }
 0x1c5   :  { %v196_v30 = vadd.f32 %v194_v29, %v186_v28 }
 0x1c7   :  { %1011 = vtanh.f32 %v196_v30  ;;  %v262_v49 = vrot.slane %v196_v30, 6 }
 0x1d4   :  { %v1012_v31 = vpop.eup %1011 }
 0x1d5   :  { %199 = vrot.lane.b32.xlu1 %v1012_v31, %s1072_s18 }
 0x247   :  { %v200_v32 = vpop.permute.xlu1 %199 }
 0x248   :  { %v202_v33 = vmul.f32 %v1010_v25, %v200_v32 }
 0x24a   :  { %v203_v34 = vpack.c.bf16 %v202_v33, %v202_v33 }
 0x24c   :  { %205 = vrot.lane.b32.xlu1 %v203_v34, %s1073_s3 }
 0x2be   :  { %v206_v35 = vpop.permute.xlu1 %205 }
 0x2bf   :  { %938 = vmatmul.mubr.msk.bf16.vlgmr.msra.gmra.mxu0 %vm134_vm3, %v206_v35 }
 0x2c0   :  { %950 = vmatpush3.bf16.msra.mxu0 %v1143_v7  ;;  %953 = vmatprep.mubr.msk.bf16.mxu0 %vm1070_vm2, %v1069_v1 }
 0x2c1   :  { %951 = vmatprep.subr.bf16.mxu0 %v1069_v1 }
 0x2c4   :  { %952 = vmatpush3.bf16.msra.mxu0 %v1151_v9 }
 0x2c5   :  { %965 = vmatprep.subr.bf16.mxu0 %v1069_v1 }
 0x37f   :  { %v244_v36 = vpop.f32.mrf.mxu0 }
 0x380   :  { %v251_v37 = vrot.slane %v244_v36, 6 }
 0x381   :  { %v939_v38 = vpop.f32.mrf.mxu0 }
 0x382   :  { %v253_v39 = vadd.f32 %v251_v37, %v1173_v15 }
 0x383   :  { %v247_v40 = vpop.f32.mrf.mxu0 }
 0x384   :  { %1013 = vtanh.f32 %v253_v39  ;;  %v871_v43 = vmul.f32 -1.442695, %v253_v39 }
 0x385   :  { %v940_v41 = vpop.f32.mrf.mxu0 }
 0x386   :  { %1015 = vpow2.f32 %v871_v43 }
 0x391   :  { %v1014_v42 = vpop.eup %1013 }
 0x392   :  { %266 = vrot.lane.b32.xlu0 %v1014_v42, %s1072_s18 }
 0x393   :  { %v1016_v44 = vpop.eup %1015 }
 0x394   :  { %v257_v45 = vadd.f32 1.0, %v1016_v44 }
 0x396   :  { %1017 = vrcp.f32 %v257_v45 }
 0x3a3   :  { %v1018_v46 = vpop.eup %1017 }
 0x3a4   :  { %v264_v50 = vmul.f32 %v1018_v46, %v262_v49 }
 0x404   :  { %v267_v47 = vpop.permute.xlu0 %266 }
 0x405   :  { %v269_v48 = vmul.f32 %v1018_v46, %v267_v47 }
 0x407   :  { %271 = vrot.lane.b32.xlu1 %v269_v48, %s1073_s3 }
 0x479   :  { %v272_v51 = vpop.permute.xlu1 %271 }
 0x47a   :  { %v274_v52 = vadd.f32 %v272_v51, %v264_v50 }
 0x47c   :  { %1019 = vtanh.f32 %v274_v52  ;;  %v341_v11 = vrot.slane %v274_v52, 6 }
 0x489   :  { %v1020_v53 = vpop.eup %1019 }
 0x48a   :  { %277 = vrot.lane.b32.xlu0 %v1020_v53, %s1072_s18 }
 0x4fc   :  { %v278_v54 = vpop.permute.xlu0 %277 }
 0x4fd   :  { %v280_v55 = vmul.f32 %v1018_v46, %v278_v54 }
 0x4ff   :  { %v281_v56 = vpack.c.bf16 %v280_v55, %v280_v55 }
 0x501   :  { %v283_v57 = vrot.slane %v281_v56, 1 }
 0x503   :  { %284 = vrot.lane.b32.xlu1 %v283_v57, %s1073_s3 }
 0x575   :  { %v285_v58 = vpop.permute.xlu1 %284 }
 0x576   :  { %946 = vmatmul.mubr.msk.bf16.vlgmr.msra.gmra.mxu1 %vm134_vm3, %v285_v58 }
 0x577   :  { %958 = vmatpush3.bf16.msra.mxu1 %v1143_v7  ;;  %961 = vmatprep.mubr.msk.bf16.mxu1 %vm1070_vm2, %v1069_v1 }
 0x578   :  { %959 = vmatprep.subr.bf16.mxu1 %v1069_v1 }
 0x57b   :  { %960 = vmatpush3.bf16.msra.mxu1 %v1151_v9 }
 0x57c   :  { %973 = vmatprep.subr.bf16.mxu1 %v1069_v1 }
 0x636   :  { %v323_v59 = vpop.f32.mrf.mxu1 }
 0x637   :  { %v330_v60 = vrot.slane %v323_v59, 4 }
 0x638   :  { %v947_v61 = vpop.f32.mrf.mxu1 }
 0x639   :  { %v332_v62 = vadd.f32 %v330_v60, %v1173_v15 }
 0x63a   :  { %v326_v63 = vpop.f32.mrf.mxu1 }
 0x63b   :  { %1021 = vtanh.f32 %v332_v62  ;;  %v873_v3 = vmul.f32 -1.442695, %v332_v62 }
 0x63c   :  { %v948_v0 = vpop.f32.mrf.mxu1 }
 0x63d   :  { %1023 = vpow2.f32 %v873_v3 }
 0x648   :  { %v1022_v2 = vpop.eup %1021 }
 0x649   :  { %345 = vrot.lane.b32.xlu0 %v1022_v2, %s1072_s18 }
 0x64a   :  { %v1024_v4 = vpop.eup %1023 }
 0x64b   :  { %v336_v5 = vadd.f32 1.0, %v1024_v4 }
 0x64d   :  { %1025 = vrcp.f32 %v336_v5 }
 0x65a   :  { %v1026_v6 = vpop.eup %1025 }
 0x65b   :  { %v343_v12 = vmul.f32 %v1026_v6, %v341_v11 }
 0x6bb   :  { %v346_v8 = vpop.permute.xlu0 %345 }
 0x6bc   :  { %v348_v10 = vmul.f32 %v1026_v6, %v346_v8 }
 0x6be   :  { %350 = vrot.lane.b32.xlu1 %v348_v10, %s1073_s3 }
 0x730   :  { %v351_v14 = vpop.permute.xlu1 %350 }
 0x731   :  { %v353_v16 = vadd.f32 %v351_v14, %v343_v12 }
 0x733   :  { %1027 = vtanh.f32 %v353_v16  ;;  %v420_v36 = vrot.slane %v353_v16, 6 }
 0x740   :  { %v1028_v17 = vpop.eup %1027 }
 0x741   :  { %356 = vrot.lane.b32.xlu0 %v1028_v17, %s1072_s18 }
 0x7b3   :  { %v357_v18 = vpop.permute.xlu0 %356 }
 0x7b4   :  { %v359_v19 = vmul.f32 %v1026_v6, %v357_v18 }
 0x7b6   :  { %v360_v20 = vpack.c.bf16 %v359_v19, %v359_v19 }
 0x7b8   :  { %v362_v21 = vrot.slane %v360_v20, 2 }
 0x7ba   :  { %363 = vrot.lane.b32.xlu1 %v362_v21, %s1073_s3 }
 0x82c   :  { %v364_v22 = vpop.permute.xlu1 %363 }
 0x82d   :  { %954 = vmatmul.mubr.msk.bf16.vlgmr.msra.gmra.mxu0 %vm134_vm3, %v364_v22 }
 0x82e   :  { %966 = vmatpush3.bf16.msra.mxu0 %v1143_v7  ;;  %969 = vmatprep.mubr.msk.bf16.mxu0 %vm1070_vm2, %v1069_v1 }
 0x82f   :  { %967 = vmatprep.subr.bf16.mxu0 %v1069_v1 }
 0x832   :  { %968 = vmatpush3.bf16.msra.mxu0 %v1151_v9 }
 0x833   :  { %981 = vmatprep.subr.bf16.mxu0 %v1069_v1 }
 0x8ed   :  { %v402_v23 = vpop.f32.mrf.mxu0 }
 0x8ee   :  { %v409_v24 = vrot.slane %v402_v23, 2 }
 0x8ef   :  { %v955_v25 = vpop.f32.mrf.mxu0 }
 0x8f0   :  { %v411_v26 = vadd.f32 %v409_v24, %v1173_v15 }
 0x8f1   :  { %v405_v27 = vpop.f32.mrf.mxu0 }
 0x8f2   :  { %1029 = vtanh.f32 %v411_v26  ;;  %v875_v30 = vmul.f32 -1.442695, %v411_v26 }
 0x8f3   :  { %v956_v28 = vpop.f32.mrf.mxu0 }
 0x8f4   :  { %1031 = vpow2.f32 %v875_v30 }
 0x8ff   :  { %v1030_v29 = vpop.eup %1029 }
 0x900   :  { %424 = vrot.lane.b32.xlu0 %v1030_v29, %s1072_s18 }
 0x901   :  { %v1032_v31 = vpop.eup %1031 }
 0x902   :  { %v415_v32 = vadd.f32 1.0, %v1032_v31 }
 0x904   :  { %1033 = vrcp.f32 %v415_v32 }
 0x911   :  { %v1034_v33 = vpop.eup %1033 }
 0x912   :  { %v422_v37 = vmul.f32 %v1034_v33, %v420_v36 }
 0x972   :  { %v425_v34 = vpop.permute.xlu0 %424 }
 0x973   :  { %v427_v35 = vmul.f32 %v1034_v33, %v425_v34 }
 0x975   :  { %429 = vrot.lane.b32.xlu1 %v427_v35, %s1073_s3 }
 0x9e7   :  { %v430_v38 = vpop.permute.xlu1 %429 }
 0x9e8   :  { %v432_v15 = vadd.f32 %v430_v38, %v422_v37 }
 0x9ea   :  { %1035 = vtanh.f32 %v432_v15  ;;  %v496_v57 = vrot.slane %v432_v15, 6 }
 0x9f7   :  { %v1036_v39 = vpop.eup %1035 }
 0x9f8   :  { %435 = vrot.lane.b32.xlu0 %v1036_v39, %s1072_s18 }
 0xa6a   :  { %v436_v40 = vpop.permute.xlu0 %435 }
 0xa6b   :  { %v438_v41 = vmul.f32 %v1034_v33, %v436_v40 }
 0xa6d   :  { %v439_v42 = vpack.c.bf16 %v438_v41, %v438_v41 }
 0xa6f   :  { %v441_v43 = vrot.slane %v439_v42, 3 }
 0xa71   :  { %442 = vrot.lane.b32.xlu1 %v441_v43, %s1073_s3 }
 0xae3   :  { %v443_v44 = vpop.permute.xlu1 %442 }
 0xae4   :  { %962 = vmatmul.mubr.msk.bf16.vlgmr.msra.gmra.mxu1 %vm134_vm3, %v443_v44 }
 0xae5   :  { %974 = vmatpush3.bf16.msra.mxu1 %v1143_v7  ;;  %977 = vmatprep.mubr.msk.bf16.mxu1 %vm1070_vm2, %v1069_v1 }
 0xae6   :  { %975 = vmatprep.subr.bf16.mxu1 %v1069_v1 }
 0xae9   :  { %976 = vmatpush3.bf16.msra.mxu1 %v1151_v9 }
 0xaea   :  { %989 = vmatprep.subr.mxu1 %v1069_v1 }
 0xba4   :  { %v481_v45 = vpop.f32.mrf.mxu1 }
 0xba5   :  { %v487_v46 = vadd.f32 %v481_v45, %v1171_v13 }
 0xba6   :  { %v963_v47 = vpop.f32.mrf.mxu1 }
 0xba7   :  { %1037 = vtanh.f32 %v487_v46  ;;  %v877_v51 = vmul.f32 -1.442695, %v487_v46 }
 0xba8   :  { %v484_v48 = vpop.f32.mrf.mxu1 }
 0xba9   :  { %1039 = vpow2.f32 %v877_v51 }
 0xbaa   :  { %v964_v49 = vpop.f32.mrf.mxu1 }
 0xbb4   :  { %v1038_v50 = vpop.eup %1037 }
 0xbb5   :  { %500 = vrot.lane.b32.xlu0 %v1038_v50, %s1072_s18 }
 0xbb6   :  { %v1040_v52 = vpop.eup %1039 }
 0xbb7   :  { %v491_v53 = vadd.f32 1.0, %v1040_v52 }
 0xbb9   :  { %1041 = vrcp.f32 %v491_v53 }
 0xbc6   :  { %v1042_v54 = vpop.eup %1041 }
 0xbc7   :  { %v498_v58 = vmul.f32 %v1042_v54, %v496_v57 }
 0xc27   :  { %v501_v55 = vpop.permute.xlu0 %500 }
 0xc28   :  { %v503_v56 = vmul.f32 %v1042_v54, %v501_v55 }
 0xc2a   :  { %505 = vrot.lane.b32.xlu1 %v503_v56, %s1073_s3 }
 0xc9c   :  { %v506_v59 = vpop.permute.xlu1 %505 }
 0xc9d   :  { %v508_v60 = vadd.f32 %v506_v59, %v498_v58 }
 0xc9f   :  { %1043 = vtanh.f32 %v508_v60 }
 0xcac   :  { %v1044_v61 = vpop.eup %1043 }
 0xcad   :  { %511 = vrot.lane.b32.xlu0 %v1044_v61, %s1072_s18 }
 0xd1f   :  { %v512_v62 = vpop.permute.xlu0 %511 }
 0xd20   :  { %v514_v63 = vmul.f32 %v1042_v54, %v512_v62 }
 0xd22   :  { %v515_v0 = vpack.c.bf16 %v514_v63, %v514_v63 }
 0xd24   :  { %517 = vrot.lane.b32.xlu1 %v515_v0, %s1073_s3 }
 0xd96   :  { %v518_v2 = vpop.permute.xlu1 %517 }
 0xd97   :  { %970 = vmatmul.mubr.msk.bf16.vlgmr.msra.gmra.mxu0 %vm134_vm3, %v518_v2 }
 0xd98   :  { %982 = vmatpush3.bf16.msra.mxu0 %v1143_v7  ;;  %985 = vmatprep.mubr.msk.bf16.mxu0 %vm1070_vm2, %v1069_v1 }
 0xd99   :  { %983 = vmatprep.subr.bf16.mxu0 %v1069_v1 }
 0xd9c   :  { %984 = vmatpush3.bf16.msra.mxu0 %v1151_v9  ;;  %v574_v9 = vrot.slane %v508_v60, 6 }
 0xe57   :  { %v556_v3 = vpop.f32.mrf.mxu0 }
 0xe58   :  { %v563_v4 = vrot.slane %v556_v3, 6  ;;  %v754_v3 = vld [vmem:[%s1285_s4 + $0x18] sm:$0xff] }
 0xe59   :  { %v971_v5 = vpop.f32.mrf.mxu0 }
 0xe5a   :  { %v565_v6 = vadd.f32 %v563_v4, %v1171_v13  ;;  %v753_v4 = vld [vmem:[%s1285_s4 + $0x10] sm:$0xff]  ;;  %v752_v5 = vld [vmem:[%s1285_s4 + $0x8] sm:$0xff] }
 0xe5b   :  { %v559_v8 = vpop.f32.mrf.mxu0 }
 0xe5c   :  { %1045 = vtanh.f32 %v565_v6  ;;  %v879_v12 = vmul.f32 -1.442695, %v565_v6  ;;  %v751_v6 = vld [vmem:[%s1285_s4] sm:$0xff] }
 0xe5d   :  { %v972_v10 = vpop.f32.mrf.mxu0 }
 0xe5e   :  { %1047 = vpow2.f32 %v879_v12 }
 0xe69   :  { %v1046_v11 = vpop.eup %1045 }
 0xe6a   :  { %578 = vrot.lane.b32.xlu0 %v1046_v11, %s1072_s18 }
 0xe6b   :  { %v1048_v7 = vpop.eup %1047 }
 0xe6c   :  { %v569_v14 = vadd.f32 1.0, %v1048_v7 }
 0xe6e   :  { %1049 = vrcp.f32 %v569_v14  ;;  %v13_v14 = vstv %s1286_s7 }
 0xe6f   :  { %14 = vst [vmem:[#allocation2] sm:$0x1] %v13_v14 }
 0xe7b   :  { %v1050_v16 = vpop.eup %1049 }
 0xe7c   :  { %v576_v19 = vmul.f32 %v1050_v16, %v574_v9  ;;  %v886_v9 = vld [vmem:[%s1288_s6] ss:$0 sm:$0xff] }
 0xedc   :  { %v579_v17 = vpop.permute.xlu0 %578 }
 0xedd   :  { %v581_v18 = vmul.f32 %v1050_v16, %v579_v17 }
 0xedf   :  { %583 = vrot.lane.b32.xlu1 %v581_v18, %s1073_s3 }
 0xf51   :  { %v584_v20 = vpop.permute.xlu1 %583 }
 0xf52   :  { %v586_v21 = vadd.f32 %v584_v20, %v576_v19 }
 0xf54   :  { %1051 = vtanh.f32 %v586_v21  ;;  %v653_v40 = vrot.slane %v586_v21, 6 }
 0xf61   :  { %v1052_v22 = vpop.eup %1051 }
 0xf62   :  { %589 = vrot.lane.b32.xlu0 %v1052_v22, %s1072_s18  ;;  %v887_v22 = vld [vmem:[#allocation2] ss:$0 sm:$0xff] }
 0xfd4   :  { %v590_v23 = vpop.permute.xlu0 %589 }
 0xfd5   :  { %v592_v24 = vmul.f32 %v1050_v16, %v590_v23 }
 0xfd7   :  { %v593_v25 = vpack.c.bf16 %v592_v24, %v592_v24 }
 0xfd9   :  { %v595_v26 = vrot.slane %v593_v25, 1 }
 0xfdb   :  { %596 = vrot.lane.b32.xlu1 %v595_v26, %s1073_s3 }
0x104d   :  { %v597_v27 = vpop.permute.xlu1 %596 }
0x104e   :  { %978 = vmatmul.mubr.msk.bf16.vlgmr.msra.gmra.mxu1 %vm134_vm3, %v597_v27 }
0x104f   :  { %997 = vmatprep.mubr.msk.f32.mxu1 %vm1070_vm2, %v1069_v1  ;;  %990 = vmatpush3.msra.mxu1 %v754_v3 }
0x1050   :  { %991 = vmatprep.subr.mxu1 %v1069_v1 }
0x1051   :  { %992 = vmatpush3.msra.mxu1 %v753_v4 }
0x1052   :  { %993 = vmatprep.subr.mxu1 %v1069_v1 }
0x1053   :  { %994 = vmatpush3.msra.mxu1 %v752_v5 }
0x1054   :  { %995 = vmatprep.subr.mxu1 %v1069_v1  ;;  %v884_v1 = vld [vmem:[%s1287_s5] ss:$0 sm:$0xff] }
0x1055   :  { %996 = vmatpush3.msra.mxu1 %v751_v6 }
0x110e   :  { %v635_v28 = vpop.f32.mrf.mxu1 }
0x110f   :  { %v642_v29 = vrot.slane %v635_v28, 4 }
0x1110   :  { %v979_v30 = vpop.f32.mrf.mxu1 }
0x1111   :  { %v644_v31 = vadd.f32 %v642_v29, %v1171_v13 }
0x1112   :  { %v638_v32 = vpop.f32.mrf.mxu1 }
0x1113   :  { %1053 = vtanh.f32 %v644_v31  ;;  %v881_v35 = vmul.f32 -1.442695, %v644_v31 }
0x1114   :  { %v980_v33 = vpop.f32.mrf.mxu1 }
0x1115   :  { %1055 = vpow2.f32 %v881_v35 }
0x1120   :  { %v1054_v34 = vpop.eup %1053 }
0x1121   :  { %657 = vrot.lane.b32.xlu0 %v1054_v34, %s1072_s18 }
0x1122   :  { %v1056_v36 = vpop.eup %1055 }
0x1123   :  { %v648_v37 = vadd.f32 1.0, %v1056_v36 }
0x1125   :  { %1057 = vrcp.f32 %v648_v37 }
0x1132   :  { %v1058_v38 = vpop.eup %1057 }
0x1133   :  { %v655_v41 = vmul.f32 %v1058_v38, %v653_v40 }
0x1193   :  { %v658_v15 = vpop.permute.xlu0 %657 }
0x1194   :  { %v660_v39 = vmul.f32 %v1058_v38, %v658_v15 }
0x1196   :  { %662 = vrot.lane.b32.xlu1 %v660_v39, %s1073_s3 }
0x1208   :  { %v663_v42 = vpop.permute.xlu1 %662 }
0x1209   :  { %v665_v43 = vadd.f32 %v663_v42, %v655_v41 }
0x120b   :  { %1059 = vtanh.f32 %v665_v43  ;;  %v732_v63 = vrot.slane %v665_v43, 6 }
0x1218   :  { %v1060_v44 = vpop.eup %1059 }
0x1219   :  { %668 = vrot.lane.b32.xlu0 %v1060_v44, %s1072_s18 }
0x128b   :  { %v669_v45 = vpop.permute.xlu0 %668 }
0x128c   :  { %v671_v46 = vmul.f32 %v1058_v38, %v669_v45 }
0x128e   :  { %v672_v47 = vpack.c.bf16 %v671_v46, %v671_v46 }
0x1290   :  { %v674_v48 = vrot.slane %v672_v47, 2 }
0x1292   :  { %675 = vrot.lane.b32.xlu1 %v674_v48, %s1073_s3 }
0x1304   :  { %v676_v49 = vpop.permute.xlu1 %675 }
0x1305   :  { %986 = vmatmul.mubr.msk.bf16.vlgmr.msra.gmra.mxu0 %vm134_vm3, %v676_v49 }
0x13c5   :  { %v714_v50 = vpop.f32.mrf.mxu0 }
0x13c6   :  { %v721_v51 = vrot.slane %v714_v50, 2 }
0x13c7   :  { %v987_v52 = vpop.f32.mrf.mxu0 }
0x13c8   :  { %v723_v53 = vadd.f32 %v721_v51, %v1171_v13 }
0x13c9   :  { %v717_v54 = vpop.f32.mrf.mxu0 }
0x13ca   :  { %1061 = vtanh.f32 %v723_v53  ;;  %v883_v57 = vmul.f32 -1.442695, %v723_v53 }
0x13cb   :  { %v988_v55 = vpop.f32.mrf.mxu0 }
0x13cc   :  { %1063 = vpow2.f32 %v883_v57 }
0x13d7   :  { %v1062_v56 = vpop.eup %1061 }
0x13d8   :  { %736 = vrot.lane.b32.xlu0 %v1062_v56, %s1072_s18 }
0x13d9   :  { %v1064_v58 = vpop.eup %1063 }
0x13da   :  { %v727_v59 = vadd.f32 1.0, %v1064_v58 }
0x13dc   :  { %1065 = vrcp.f32 %v727_v59 }
0x13e9   :  { %v1066_v60 = vpop.eup %1065 }
0x13ea   :  { %v734_v0 = vmul.f32 %v1066_v60, %v732_v63 }
0x144a   :  { %v737_v61 = vpop.permute.xlu0 %736 }
0x144b   :  { %v739_v62 = vmul.f32 %v1066_v60, %v737_v61 }
0x144d   :  { %741 = vrot.lane.b32.xlu1 %v739_v62, %s1073_s3 }
0x14bf   :  { %v742_v2 = vpop.permute.xlu1 %741 }
0x14c0   :  { %v744_v13 = vadd.f32 %v742_v2, %v734_v0 }
0x14c2   :  { %1067 = vtanh.f32 %v744_v13 }
0x14cf   :  { %v1068_v8 = vpop.eup %1067 }
0x14d0   :  { %747 = vrot.lane.b32.xlu0 %v1068_v8, %s1072_s18 }
0x1542   :  { %v748_v10 = vpop.permute.xlu0 %747 }
0x1543   :  { %v750_v11 = vmul.f32 %v1066_v60, %v748_v10 }
0x1545   :  { %v763_v12 = vrot.slane %v750_v11, 6 }
0x1547   :  { %764 = vrot.lane.b32.xlu1 %v763_v12, %s1073_s3 }
0x15b9   :  { %v765_v7 = vpop.permute.xlu1 %764 }
0x15ba   :  { %998 = vmatmul.mubr.msk.f32.vlgmr.msra.gmra.mxu1 %vm134_vm3, %v765_v7 }
0x167a   :  { %v834_v16 = vpop.f32.mrf.mxu1 }
0x167b   :  { %v835_v17 = vadd.f32 %v884_v1, %v834_v16 }
0x167c   :  { %v999_v18 = vpop.f32.mrf.mxu1 }
0x167d   :  { %v838_v19 = vmax.f32 %v835_v17, 0.0 }
0x167f   :  { %v846_v20 = vmul.f32 %v886_v9, %v838_v19 }
0x1681   :  { %v848_v21 = vsel %vm847_vm4, %v846_v20, 0.0 }
0x1682   :  { %849 = vadd.xlane.f32.xlu0 %v848_v21 }
0x170b   :  { %v850_v23 = vpop.xlane.xlu0 %849 }
0x170c   :  { %v858_v24 = vadd.f32 %v887_v22, %v850_v23 }
0x170e   :  { %860 = vst.msk [vmem:[%s1289_s8] sm:$0x3] %vm859_vm5, %v858_v24 }

</bundles_post_ra>
